<compile_context>
chip_gen: v6e
topology: v6e:2x2x1
jax: 0.10.0
libtpu: 0.0.40
codegen_flags: <defaults>
</compile_context>

<pallas_src>
import functools

import jax
import jax.numpy as jnp
from jax import lax
from jax.experimental import pallas as pl
from jax.experimental.pallas import tpu as pltpu


def _monkey_kernel(x_ref, wih_ref, bias_ref, whh_ref, wfc_ref, bfc_ref, h0_ref,
                   out_ref, hlast_ref, pre_scr, *, seq_len):
    """Single-shot kernel: batched input projection + sequential tanh RNN + fc.

    x_ref   : (T*B, E)  time-major flattened embedded tokens
    wih_ref : (E, H)    pre-transposed W_ih
    bias_ref: (1, H)    folded b_ih + b_hh
    whh_ref : (H, H)    pre-transposed W_hh
    wfc_ref : (H, Op)   pre-transposed W_fc, zero-padded to Op lanes
    bfc_ref : (1, Op)   b_fc, zero-padded
    h0_ref  : (B, H)    initial hidden state
    out_ref : (B, Op)   fc(last hidden)   (padded; wrapper slices to O)
    hlast_ref:(B, H)    final hidden state
    pre_scr : (T*B, H)  VMEM scratch for the hoisted input projection
    """
    batch = h0_ref.shape[0]

    # Hoisted input projection: ONE (T*B, E) @ (E, H) MXU matmul for the whole
    # sequence, plus a single folded-bias broadcast add -- none of this sits on
    # the recurrent dependency chain.
    pre_scr[...] = (
        jnp.dot(x_ref[...], wih_ref[...], preferred_element_type=jnp.float32)
        + bias_ref[...]
    )

    w_hh = whh_ref[...]  # load once; resident in vregs/VMEM for the whole loop

    def step(t, h):
        pre_t = pre_scr[pl.ds(t * batch, batch), :]          # (B, H)
        return jnp.tanh(
            pre_t + jnp.dot(h, w_hh, preferred_element_type=jnp.float32))

    # Recurrence is strictly sequential; unroll the short fixed trip-count so the
    # LLO scheduler sees the whole chain.
    h_last = lax.fori_loop(0, seq_len, step, h0_ref[...], unroll=True)

    hlast_ref[...] = h_last.astype(hlast_ref.dtype)
    out_ref[...] = (
        jnp.dot(h_last, wfc_ref[...], preferred_element_type=jnp.float32)
        + bfc_ref[...]
    ).astype(out_ref.dtype)


def monkey_brain_forward(tokens, params, hidden=None):
    """tokens: int32 (B, T). Returns (out_fc (B, O), hidden (1, B, H))."""
    emb, w_ih, w_hh, b_ih, b_hh, w_fc, b_fc = (
        params["embedding"], params["w_ih"], params["w_hh"],
        params["b_ih"], params["b_hh"], params["w_fc"], params["b_fc"])

    B, T = tokens.shape
    E = emb.shape[1]
    H = w_hh.shape[0]
    O = w_fc.shape[1]

    # Glue: embedding gather (data-dependent gather stays in XLA), time-major,
    # flattened to (T*B, E) so the input projection is one big matmul.
    x_flat = jnp.transpose(emb[tokens], (1, 0, 2)).reshape(T * B, E)
    x_flat = x_flat.astype(jnp.float32)

    # Fold the two RNN biases once.
    bias = (b_ih + b_hh).reshape(1, H).astype(jnp.float32)

    # Lane-dense fc output: pad output dim to a multiple of 128 lanes.
    Op = pl.cdiv(O, 128) * 128
    w_fc_p = jnp.zeros((H, Op), jnp.float32).at[:, :O].set(w_fc)
    b_fc_p = jnp.zeros((1, Op), jnp.float32).at[:, :O].set(b_fc.reshape(1, O))

    # Thread the caller-provided initial hidden state into the kernel.
    if hidden is None:
        h0 = jnp.zeros((B, H), jnp.float32)
    else:
        h0 = jnp.asarray(hidden, jnp.float32).reshape(B, H)

    kernel = functools.partial(_monkey_kernel, seq_len=T)

    out_p, h_last = pl.pallas_call(
        kernel,
        out_shape=(jax.ShapeDtypeStruct((B, Op), jnp.float32),
                   jax.ShapeDtypeStruct((B, H), jnp.float32)),
        scratch_shapes=[pltpu.VMEM((T * B, H), jnp.float32)],
    )(x_flat, w_ih, bias, w_hh, w_fc_p, b_fc_p, h0)

    return out_p[:, :O], h_last[None, :, :]


def init_params(key, vocab_size, embedding_dim, hidden_dim, output_dim):
    ks = jax.random.split(key, 7)
    s = 0.1
    return {
        "embedding": s * jax.random.normal(ks[0], (vocab_size, embedding_dim), jnp.float32),
        # Stored pre-transposed: x @ w_ih == x @ W_ih_pt.T
        "w_ih": s * jax.random.normal(ks[1], (embedding_dim, hidden_dim), jnp.float32),
        "w_hh": s * jax.random.normal(ks[2], (hidden_dim, hidden_dim), jnp.float32),
        "b_ih": s * jax.random.normal(ks[3], (1, hidden_dim), jnp.float32),
        "b_hh": s * jax.random.normal(ks[4], (1, hidden_dim), jnp.float32),
        "w_fc": s * jax.random.normal(ks[5], (hidden_dim, output_dim), jnp.float32),
        "b_fc": s * jax.random.normal(ks[6], (1, output_dim), jnp.float32),
    }


def reference_forward(tokens, params, hidden=None):
    """Pure-JAX reference matching PyTorch nn.Embedding -> nn.RNN -> nn.Linear."""
    x = params["embedding"][tokens]                       # (B, T, E)
    B = x.shape[0]
    H = params["w_hh"].shape[0]

    h0 = jnp.zeros((B, H), jnp.float32) if hidden is None else hidden[0]

    def step(h, x_t):
        h_new = jnp.tanh(x_t @ params["w_ih"] + params["b_ih"]
                         + h @ params["w_hh"] + params["b_hh"])
        return h_new, h_new

    h_last, _ = lax.scan(step, h0, jnp.transpose(x, (1, 0, 2)))
    out = h_last @ params["w_fc"] + params["b_fc"]
    return out, h_last[None]


if __name__ == "__main__":
    vocab_size, embedding_dim, hidden_dim, output_dim = 50, 32, 32, 8
    B, T = 2, 8

    key = jax.random.PRNGKey(0)
    k_tok, k_par, k_h = jax.random.split(key, 3)
    tokens = jax.random.randint(k_tok, (B, T), 0, vocab_size, dtype=jnp.int32)
    params = init_params(k_par, vocab_size, embedding_dim, hidden_dim, output_dim)

    # Default path (hidden=None), matching the PyTorch module's default call.
    out_fc, hidden = monkey_brain_forward(tokens, params)
    out_fc, hidden = jax.block_until_ready((out_fc, hidden))
    ref_out, ref_hidden = reference_forward(tokens, params)
    assert out_fc.shape == (B, output_dim)
    assert hidden.shape == (1, B, hidden_dim)
    assert jnp.allclose(out_fc, ref_out, atol=1e-3, rtol=1e-3)
    assert jnp.allclose(hidden, ref_hidden, atol=1e-3, rtol=1e-3)

    # Non-zero initial hidden state (now threaded into the kernel).
    h_init = 0.1 * jax.random.normal(k_h, (1, B, hidden_dim), jnp.float32)
    out2, hid2 = jax.block_until_ready(monkey_brain_forward(tokens, params, h_init))
    ref_out2, ref_hid2 = reference_forward(tokens, params, h_init)
    assert jnp.allclose(out2, ref_out2, atol=1e-3, rtol=1e-3)
    assert jnp.allclose(hid2, ref_hid2, atol=1e-3, rtol=1e-3)

    print("KERNEL_OK")
</pallas_src>

<mosaic_0001>
module attributes {stable_mosaic.version = 11 : i64} {
  func.func @_monkey_kernel(%arg0: memref<16x32xf32, #tpu.memory_space<vmem>>, %arg1: memref<32x32xf32, #tpu.memory_space<vmem>>, %arg2: memref<1x32xf32, #tpu.memory_space<vmem>>, %arg3: memref<32x32xf32, #tpu.memory_space<vmem>>, %arg4: memref<32x128xf32, #tpu.memory_space<vmem>>, %arg5: memref<1x128xf32, #tpu.memory_space<vmem>>, %arg6: memref<2x32xf32, #tpu.memory_space<vmem>>, %arg7: memref<2x128xf32, #tpu.memory_space<vmem>>, %arg8: memref<2x32xf32, #tpu.memory_space<vmem>>, %arg9: memref<16x32xf32, #tpu.memory_space<vmem>>) attributes {dimension_semantics = [], scalar_prefetch = 0 : i64, scratch_operands = 1 : i64, tpu.core_type = #tpu.core_type<tc>} {
    %c0 = arith.constant 0 : index
    %c0_0 = arith.constant 0 : index
    %0 = vector.load %arg0[%c0, %c0_0] : memref<16x32xf32, #tpu.memory_space<vmem>>, vector<16x32xf32>
    %c0_1 = arith.constant 0 : index
    %c0_2 = arith.constant 0 : index
    %1 = vector.load %arg1[%c0_1, %c0_2] : memref<32x32xf32, #tpu.memory_space<vmem>>, vector<32x32xf32>
    %cst = arith.constant dense<0.000000e+00> : vector<16x32xf32>
    %2 = tpu.matmul %0, %1, %cst {dimension_numbers = #tpu.dot_dimension_numbers<[1], [0], [0], [1], [0, 0, 1, 1], [], []>} : vector<16x32xf32>, vector<32x32xf32>, vector<16x32xf32> -> vector<16x32xf32>
    %c0_3 = arith.constant 0 : index
    %c0_4 = arith.constant 0 : index
    %3 = vector.load %arg2[%c0_3, %c0_4] : memref<1x32xf32, #tpu.memory_space<vmem>>, vector<1x32xf32>
    %4 = vector.broadcast %3 : vector<1x32xf32> to vector<16x32xf32>
    %5 = arith.addf %2, %4 : vector<16x32xf32>
    %c0_5 = arith.constant 0 : index
    %c0_6 = arith.constant 0 : index
    %6 = vector.load %arg9[%c0_5, %c0_6] : memref<16x32xf32, #tpu.memory_space<vmem>>, vector<16x32xf32>
    tpu.vector_store %arg9[%c0_5, %c0_6], %5 {strides = array<i32>} : memref<16x32xf32, #tpu.memory_space<vmem>>, vector<16x32xf32>,
    %c0_7 = arith.constant 0 : index
    %c0_8 = arith.constant 0 : index
    %7 = vector.load %arg3[%c0_7, %c0_8] : memref<32x32xf32, #tpu.memory_space<vmem>>, vector<32x32xf32>
    %c0_9 = arith.constant 0 : index
    %c0_10 = arith.constant 0 : index
    %8 = vector.load %arg6[%c0_9, %c0_10] : memref<2x32xf32, #tpu.memory_space<vmem>>, vector<2x32xf32>
    %c0_i32 = arith.constant 0 : i32
    %c2_i32 = arith.constant 2 : i32
    %9 = arith.muli %c0_i32, %c2_i32 : i32
    %10 = arith.index_cast %9 : i32 to index
    %c0_11 = arith.constant 0 : index
    %11 = vector.load %arg9[%10, %c0_11] : memref<16x32xf32, #tpu.memory_space<vmem>>, vector<2x32xf32>
    %cst_12 = arith.constant dense<0.000000e+00> : vector<2x32xf32>
    %12 = tpu.matmul %8, %7, %cst_12 {dimension_numbers = #tpu.dot_dimension_numbers<[1], [0], [0], [1], [0, 0, 1, 1], [], []>} : vector<2x32xf32>, vector<32x32xf32>, vector<2x32xf32> -> vector<2x32xf32>
    %13 = arith.addf %11, %12 : vector<2x32xf32>
    %14 = math.tanh %13 : vector<2x32xf32>
    %c1_i32 = arith.constant 1 : i32
    %c2_i32_13 = arith.constant 2 : i32
    %15 = arith.muli %c1_i32, %c2_i32_13 : i32
    %16 = arith.index_cast %15 : i32 to index
    %c0_14 = arith.constant 0 : index
    %17 = vector.load %arg9[%16, %c0_14] : memref<16x32xf32, #tpu.memory_space<vmem>>, vector<2x32xf32>
    %cst_15 = arith.constant dense<0.000000e+00> : vector<2x32xf32>
    %18 = tpu.matmul %14, %7, %cst_15 {dimension_numbers = #tpu.dot_dimension_numbers<[1], [0], [0], [1], [0, 0, 1, 1], [], []>} : vector<2x32xf32>, vector<32x32xf32>, vector<2x32xf32> -> vector<2x32xf32>
    %19 = arith.addf %17, %18 : vector<2x32xf32>
    %20 = math.tanh %19 : vector<2x32xf32>
    %c2_i32_16 = arith.constant 2 : i32
    %c2_i32_17 = arith.constant 2 : i32
    %21 = arith.muli %c2_i32_16, %c2_i32_17 : i32
    %22 = arith.index_cast %21 : i32 to index
    %c0_18 = arith.constant 0 : index
    %23 = vector.load %arg9[%22, %c0_18] : memref<16x32xf32, #tpu.memory_space<vmem>>, vector<2x32xf32>
    %cst_19 = arith.constant dense<0.000000e+00> : vector<2x32xf32>
    %24 = tpu.matmul %20, %7, %cst_19 {dimension_numbers = #tpu.dot_dimension_numbers<[1], [0], [0], [1], [0, 0, 1, 1], [], []>} : vector<2x32xf32>, vector<32x32xf32>, vector<2x32xf32> -> vector<2x32xf32>
    %25 = arith.addf %23, %24 : vector<2x32xf32>
    %26 = math.tanh %25 : vector<2x32xf32>
    %c3_i32 = arith.constant 3 : i32
    %c2_i32_20 = arith.constant 2 : i32
    %27 = arith.muli %c3_i32, %c2_i32_20 : i32
    %28 = arith.index_cast %27 : i32 to index
    %c0_21 = arith.constant 0 : index
    %29 = vector.load %arg9[%28, %c0_21] : memref<16x32xf32, #tpu.memory_space<vmem>>, vector<2x32xf32>
    %cst_22 = arith.constant dense<0.000000e+00> : vector<2x32xf32>
    %30 = tpu.matmul %26, %7, %cst_22 {dimension_numbers = #tpu.dot_dimension_numbers<[1], [0], [0], [1], [0, 0, 1, 1], [], []>} : vector<2x32xf32>, vector<32x32xf32>, vector<2x32xf32> -> vector<2x32xf32>
    %31 = arith.addf %29, %30 : vector<2x32xf32>
    %32 = math.tanh %31 : vector<2x32xf32>
    %c4_i32 = arith.constant 4 : i32
    %c2_i32_23 = arith.constant 2 : i32
    %33 = arith.muli %c4_i32, %c2_i32_23 : i32
    %34 = arith.index_cast %33 : i32 to index
    %c0_24 = arith.constant 0 : index
    %35 = vector.load %arg9[%34, %c0_24] : memref<16x32xf32, #tpu.memory_space<vmem>>, vector<2x32xf32>
    %cst_25 = arith.constant dense<0.000000e+00> : vector<2x32xf32>
    %36 = tpu.matmul %32, %7, %cst_25 {dimension_numbers = #tpu.dot_dimension_numbers<[1], [0], [0], [1], [0, 0, 1, 1], [], []>} : vector<2x32xf32>, vector<32x32xf32>, vector<2x32xf32> -> vector<2x32xf32>
    %37 = arith.addf %35, %36 : vector<2x32xf32>
    %38 = math.tanh %37 : vector<2x32xf32>
    %c5_i32 = arith.constant 5 : i32
    %c2_i32_26 = arith.constant 2 : i32
    %39 = arith.muli %c5_i32, %c2_i32_26 : i32
    %40 = arith.index_cast %39 : i32 to index
    %c0_27 = arith.constant 0 : index
    %41 = vector.load %arg9[%40, %c0_27] : memref<16x32xf32, #tpu.memory_space<vmem>>, vector<2x32xf32>
    %cst_28 = arith.constant dense<0.000000e+00> : vector<2x32xf32>
    %42 = tpu.matmul %38, %7, %cst_28 {dimension_numbers = #tpu.dot_dimension_numbers<[1], [0], [0], [1], [0, 0, 1, 1], [], []>} : vector<2x32xf32>, vector<32x32xf32>, vector<2x32xf32> -> vector<2x32xf32>
    %43 = arith.addf %41, %42 : vector<2x32xf32>
    %44 = math.tanh %43 : vector<2x32xf32>
    %c6_i32 = arith.constant 6 : i32
    %c2_i32_29 = arith.constant 2 : i32
    %45 = arith.muli %c6_i32, %c2_i32_29 : i32
    %46 = arith.index_cast %45 : i32 to index
    %c0_30 = arith.constant 0 : index
    %47 = vector.load %arg9[%46, %c0_30] : memref<16x32xf32, #tpu.memory_space<vmem>>, vector<2x32xf32>
    %cst_31 = arith.constant dense<0.000000e+00> : vector<2x32xf32>
    %48 = tpu.matmul %44, %7, %cst_31 {dimension_numbers = #tpu.dot_dimension_numbers<[1], [0], [0], [1], [0, 0, 1, 1], [], []>} : vector<2x32xf32>, vector<32x32xf32>, vector<2x32xf32> -> vector<2x32xf32>
    %49 = arith.addf %47, %48 : vector<2x32xf32>
    %50 = math.tanh %49 : vector<2x32xf32>
    %c7_i32 = arith.constant 7 : i32
    %c2_i32_32 = arith.constant 2 : i32
    %51 = arith.muli %c7_i32, %c2_i32_32 : i32
    %52 = arith.index_cast %51 : i32 to index
    %c0_33 = arith.constant 0 : index
    %53 = vector.load %arg9[%52, %c0_33] : memref<16x32xf32, #tpu.memory_space<vmem>>, vector<2x32xf32>
    %cst_34 = arith.constant dense<0.000000e+00> : vector<2x32xf32>
    %54 = tpu.matmul %50, %7, %cst_34 {dimension_numbers = #tpu.dot_dimension_numbers<[1], [0], [0], [1], [0, 0, 1, 1], [], []>} : vector<2x32xf32>, vector<32x32xf32>, vector<2x32xf32> -> vector<2x32xf32>
    %55 = arith.addf %53, %54 : vector<2x32xf32>
    %56 = math.tanh %55 : vector<2x32xf32>
    %c8_i32 = arith.constant 8 : i32
    %c0_35 = arith.constant 0 : index
    %c0_36 = arith.constant 0 : index
    %57 = vector.load %arg8[%c0_35, %c0_36] : memref<2x32xf32, #tpu.memory_space<vmem>>, vector<2x32xf32>
    tpu.vector_store %arg8[%c0_35, %c0_36], %56 {strides = array<i32>} : memref<2x32xf32, #tpu.memory_space<vmem>>, vector<2x32xf32>,
    %c0_37 = arith.constant 0 : index
    %c0_38 = arith.constant 0 : index
    %58 = vector.load %arg4[%c0_37, %c0_38] : memref<32x128xf32, #tpu.memory_space<vmem>>, vector<32x128xf32>
    %cst_39 = arith.constant dense<0.000000e+00> : vector<2x128xf32>
    %59 = tpu.matmul %56, %58, %cst_39 {dimension_numbers = #tpu.dot_dimension_numbers<[1], [0], [0], [1], [0, 0, 1, 1], [], []>} : vector<2x32xf32>, vector<32x128xf32>, vector<2x128xf32> -> vector<2x128xf32>
    %c0_40 = arith.constant 0 : index
    %c0_41 = arith.constant 0 : index
    %60 = vector.load %arg5[%c0_40, %c0_41] : memref<1x128xf32, #tpu.memory_space<vmem>>, vector<1x128xf32>
    %61 = vector.broadcast %60 : vector<1x128xf32> to vector<2x128xf32>
    %62 = arith.addf %59, %61 : vector<2x128xf32>
    %c0_42 = arith.constant 0 : index
    %c0_43 = arith.constant 0 : index
    %63 = vector.load %arg7[%c0_42, %c0_43] : memref<2x128xf32, #tpu.memory_space<vmem>>, vector<2x128xf32>
    tpu.vector_store %arg7[%c0_42, %c0_43], %62 {strides = array<i32>} : memref<2x128xf32, #tpu.memory_space<vmem>>, vector<2x128xf32>,
    return
  }
}

</mosaic_0001>

<bundles_post_ra>
// kernel: tpu_custom_call.1
= control target key start
LH: loop header
LB: loop body
LE: loop exit
PB: predicated region body
PF: predicated region fallthrough
CT: control target
= control target key end

     0   :  { %14 = vsyncpa [#allocation4], 0  ;;  %s1444_s0 = inlined_call_operand.hbm [shape: f32[16,32], index: 0, kind: input, shape index: {}]   ;;  %s1445_s1 = inlined_call_operand.hbm [shape: f32[32,32], index: 1, kind: input, shape index: {}]   ;;  %s1446_s2 = inlined_call_operand.vmem [shape: f32[1,32], index: 2, kind: input, shape index: {}]   ;;  %s1447_s3 = inlined_call_operand.hbm [shape: f32[32,32], index: 3, kind: input, shape index: {}]   ;;  %s1448_s4 = inlined_call_operand.hbm [shape: f32[32,128], index: 4, kind: input, shape index: {}]   ;;  %s1449_s5 = inlined_call_operand.vmem [shape: f32[1,128], index: 5, kind: input, shape index: {}]   ;;  %s1450_s6 = inlined_call_operand.vmem [shape: f32[2,32], index: 6, kind: input, shape index: {}]   ;;  %s1451_s7 = inlined_call_operand.hbm [shape: f32[2,128], index: 7, kind: output, shape index: {0}]   ;;  %s1452_s8 = inlined_call_operand.hbm [shape: f32[2,32], index: 8, kind: output, shape index: {1}]  }
   0x1   :  { %15 = vsyncpa [#allocation7], 0 }
   0x2   :  { %16 = vsyncpa [#allocation10], 0 }
   0x3   :  { %17 = vsyncpa [#allocation5], 0 }
   0x4   :  { %18 = vsyncpa [#allocation13], 0  ;;  %s1243_s27 = smov [#allocation6]   ;;  %s1244_s29 = smov [#allocation3]  }
   0x5   :  { %s36_s28 = sshll.u32 %s1243_s27, 4  ;;  %s24_s30 = sshll.u32 %s1244_s29, 4  ;;  %s37_s28 = int_to_ptr.vmem [resolvable:$true] %s36_s28  ;;  %s25_s30 = int_to_ptr.vmem [resolvable:$true] %s24_s30 }
   0x6   :  { %s1121_s9 = scalar_lea.vmem %s37_s28, 512  ;;  %p1126_p1 = scmp.lt.s32.totalorder %s37_s28, %s37_s28 }
   0x7   :  { %p1122_p0 = scmp.ne.s32.totalorder %s37_s28, %s1121_s9  ;;  %p1127_p2 = scmp.lt.s32.totalorder %s1121_s9, %s1121_s9 }
   0x9   :  { %p1128_p3 = por %p1127_p2, %p1126_p1 }
   0xb   :  { %p1129_p4 = pnand %p1128_p3, %p1122_p0 }
   0xd   :  { %1132 = shalt.err (!%p1129_p4)
}
   0xe   :  { %s1245_s10 = smov 128   ;;  %s1246_s11 = smov 8  }
   0xf   :  { %42 = dma.hbm_to_vmem [thread:$0]  %s1445_s1, 512, %s37_s28, [#allocation7], %s1245_s10, %s1245_s10, %s1246_s11  }
  0x10   :  { %s1141_s14 = scalar_lea.vmem %s25_s30, 256  ;;  %p1146_p6 = scmp.lt.s32.totalorder %s25_s30, %s25_s30 }
  0x11   :  { %p1142_p5 = scmp.ne.s32.totalorder %s25_s30, %s1141_s14  ;;  %p1147_p7 = scmp.lt.s32.totalorder %s1141_s14, %s1141_s14 }
  0x13   :  { %p1148_p8 = por %p1147_p7, %p1146_p6 }
  0x15   :  { %p1149_p9 = pnand %p1148_p8, %p1142_p5 }
  0x17   :  { %1152 = shalt.err (!%p1149_p9)
}
  0x18   :  { %30 = dma.hbm_to_vmem [thread:$0]  %s1444_s0, 256, %s25_s30, [#allocation4], %s1245_s10, %s1245_s10, %s1246_s11  }
  0x19   :  { %s1247_s17 = smov [#allocation8]   ;;  %s1248_s19 = smov [#allocation9]  }
  0x1a   :  { %s50_s18 = sshll.u32 %s1247_s17, 4  ;;  %s62_s20 = sshll.u32 %s1248_s19, 4  ;;  %s51_s18 = int_to_ptr.vmem [resolvable:$true] %s50_s18  ;;  %s63_s20 = int_to_ptr.vmem [resolvable:$true] %s62_s20 }
  0x1b   :  { %s1161_s1 = scalar_lea.vmem %s51_s18, 512  ;;  %p1166_p11 = scmp.lt.s32.totalorder %s51_s18, %s51_s18 }
  0x1c   :  { %p1162_p10 = scmp.ne.s32.totalorder %s51_s18, %s1161_s1  ;;  %p1167_p12 = scmp.lt.s32.totalorder %s1161_s1, %s1161_s1 }
  0x1e   :  { %p1168_p13 = por %p1167_p12, %p1166_p11 }
  0x20   :  { %p1169_p0 = pnand %p1168_p13, %p1162_p10 }
  0x22   :  { %1172 = shalt.err (!%p1169_p0)
}
  0x23   :  { %56 = dma.hbm_to_vmem [thread:$0]  %s1447_s3, 512, %s51_s18, [#allocation7], %s1245_s10, %s1245_s10, %s1246_s11  }
  0x24   :  { %s1181_s0 = scalar_lea.vmem %s63_s20, 512  ;;  %p1186_p2 = scmp.lt.s32.totalorder %s63_s20, %s63_s20 }
  0x25   :  { %p1182_p1 = scmp.ne.s32.totalorder %s63_s20, %s1181_s0  ;;  %p1187_p3 = scmp.lt.s32.totalorder %s1181_s0, %s1181_s0 }
  0x27   :  { %p1188_p4 = por %p1187_p3, %p1186_p2 }
  0x29   :  { %p1189_p5 = pnand %p1188_p4, %p1182_p1 }
  0x2b   :  { %1192 = shalt.err (!%p1189_p5)
}
  0x2c   :  { %68 = dma.hbm_to_vmem [thread:$0]  %s1448_s4, 512, %s63_s20, [#allocation10], %s1245_s10, %s1245_s10, %s1246_s11  }
  0x2d   :  { %1233 = dma.done.wait [#allocation4], 256  }
  0x2e   :  { %1234 = vsyncadd [#allocation4], 4294967040 }
  0x2f   :  { %1235 = dma.done.wait [#allocation7], 1024  }
  0x30   :  { %1236 = vsyncadd [#allocation7], 4294966272 }
  0x31   :  { %1237 = dma.done.wait [#allocation10], 512  }
  0x32   :  { %1238 = vsyncadd [#allocation10], 4294966784  ;;  %v1249_v0 = vmov 0.0   ;;  %vm1250_vm0 = vmmov 0   ;;  %vm98_vm1 = vcmask 261120   ;;  %v90_v1 = vld [vmem:[#allocation6 + $0x18] sm:$0xff] }
  0x33   :  { %988 = vmatprep.subr.mxu1 %v1249_v0  ;;  %996 = vmatprep.mubr.msk.f32.mxu1 %vm1250_vm0, %v1249_v0  ;;  %v89_v2 = vld [vmem:[#allocation6 + $0x10] sm:$0xff]  ;;  %v88_v4 = vld [vmem:[#allocation6 + $0x8] sm:$0xff]  ;;  %v1326_v5 = vld [vmem:[#allocation8 + $0x18] sm:$0xff]  ;;  %vm795_vm2 = vcmask 254976  }
  0x34   :  { %977 = vmatprep.subr.mxu0 %v90_v1  ;;  %v85_v3 = vld [vmem:[#allocation3] sm:$0xff]  ;;  %989 = vmatpush3.msra.mxu1 %v1326_v5  ;;  %v87_v7 = vld [vmem:[#allocation6] sm:$0xff]  ;;  %v1332_v8 = vld [vmem:[#allocation8 + $0x8] sm:$0xff] }
  0x35   :  { %978 = vmatpush3.msra.mxu0 %v90_v1  ;;  %985 = vmatprep.mubr.msk.f32.mxu0 %vm98_vm1, %v85_v3  ;;  %v1328_v6 = vld [vmem:[#allocation8 + $0x10] sm:$0xff]  ;;  %v86_v9 = vld [vmem:[#allocation3 + $0x8] sm:$0xff]  ;;  %v1336_v10 = vld [vmem:[#allocation8] sm:$0xff] }
  0x36   :  { %979 = vmatprep.subr.mxu0 %v89_v2  ;;  %990 = vmatprep.subr.mxu1 %v1249_v0  ;;  %v186_v11 = vld [vmem:[%s1450_s6] sm:$0x3]  ;;  %v800_v52 = vld [vmem:[#allocation9 + $0x18] sm:$0xff]  ;;  %v799_v53 = vld [vmem:[#allocation9 + $0x10] sm:$0xff] }
  0x37   :  { %980 = vmatpush3.msra.mxu0 %v89_v2  ;;  %991 = vmatpush3.msra.mxu1 %v1328_v6  ;;  %v913_v12 = vld [vmem:[%s1446_s2] ss:$0 sm:$0xff]  ;;  %v798_v54 = vld [vmem:[#allocation9 + $0x8] sm:$0xff]  ;;  %s1251_s2 = smov [#allocation12]  }
  0x38   :  { %981 = vmatprep.subr.mxu0 %v88_v4  ;;  %992 = vmatprep.subr.mxu1 %v1249_v0  ;;  %v797_v55 = vld [vmem:[#allocation9] sm:$0xff]  ;;  %s898_s26 = sshll.u32 %s1251_s2, 4  ;;  %s899_s26 = int_to_ptr.vmem [resolvable:$true] %s898_s26 }
  0x39   :  { %982 = vmatpush3.msra.mxu0 %v88_v4  ;;  %993 = vmatpush3.msra.mxu1 %v1332_v8  ;;  %s1193_s27 = scalar_lea.vmem %s899_s26, 32  ;;  %p1198_p7 = scmp.lt.s32.totalorder %s899_s26, %s899_s26 }
  0x3a   :  { %983 = vmatprep.subr.mxu0 %v87_v7  ;;  %994 = vmatprep.subr.mxu1 %v1249_v0  ;;  %p1194_p6 = scmp.ne.s32.totalorder %s899_s26, %s1193_s27  ;;  %p1199_p8 = scmp.lt.s32.totalorder %s1193_s27, %s1193_s27 }
  0x3b   :  { %984 = vmatpush3.msra.mxu0 %v87_v7  ;;  %995 = vmatpush3.msra.mxu1 %v1336_v10 }
  0x3c   :  { %986 = vmatmul.mubr.msk.f32.vlgmr.msra.gmra.mxu0 %vm98_vm1, %v86_v9  ;;  %997 = vmatmul.mubr.msk.f32.vlgmr.msra.gmra.mxu1 %vm98_vm1, %v186_v11  ;;  %p1200_p9 = por %p1199_p8, %p1198_p7 }
  0x3d   :  { %999 = vmatprep.subr.mxu0 %v1249_v0  ;;  %1007 = vmatprep.mubr.msk.f32.mxu0 %vm1250_vm0, %v1249_v0 }
  0x3e   :  { %1000 = vmatpush3.msra.mxu0 %v1326_v5  ;;  %1010 = vmatprep.subr.mxu1 %v1249_v0  ;;  %p1201_p10 = pnand %p1200_p9, %p1194_p6 }
  0x3f   :  { %1001 = vmatprep.subr.mxu0 %v1249_v0  ;;  %1011 = vmatpush3.msra.mxu1 %v1326_v5 }
  0x40   :  { %1002 = vmatpush3.msra.mxu0 %v1328_v6  ;;  %1012 = vmatprep.subr.mxu1 %v1249_v0 }
  0x41   :  { %1003 = vmatprep.subr.mxu0 %v1249_v0  ;;  %1013 = vmatpush3.msra.mxu1 %v1328_v6 }
  0x42   :  { %1004 = vmatpush3.msra.mxu0 %v1332_v8  ;;  %1014 = vmatprep.subr.mxu1 %v1249_v0 }
  0x43   :  { %1005 = vmatprep.subr.mxu0 %v1249_v0  ;;  %1015 = vmatpush3.msra.mxu1 %v1332_v8 }
  0x44   :  { %1006 = vmatpush3.msra.mxu0 %v1336_v10  ;;  %1016 = vmatprep.subr.mxu1 %v1249_v0 }
  0x45   :  { %1018 = vmatprep.mubr.msk.f32.mxu1 %vm1250_vm0, %v1249_v0  ;;  %1017 = vmatpush3.msra.mxu1 %v1336_v10 }
  0x46   :  { %1021 = vmatprep.subr.mxu0 %v1249_v0  ;;  %1032 = vmatprep.subr.mxu1 %v1249_v0 }
  0xfc   :  { %v987_v13 = vpop.f32.mrf.mxu0  ;;  %v257_v15 = vpop.f32.mrf.mxu1 }
  0xfd   :  { %v177_v14 = vadd.f32 %v987_v13, %v913_v12 }
  0xfe   :  { %v171_v16 = vpop.f32.mrf.mxu0  ;;  %v998_v18 = vpop.f32.mrf.mxu1 }
  0xff   :  { %181 = vst.msk [vmem:[#allocation2 + $0x8] sm:$0xff] %vm98_vm1, %v177_v14  ;;  %v172_v17 = vadd.f32 %v913_v12, %v171_v16 }
 0x101   :  { %180 = vst.msk [vmem:[#allocation2] sm:$0xff] %vm98_vm1, %v172_v17 }
 0x106   :  { %v491_v37 = vld [vmem:[#allocation2 + $0x8] sm:$0x3]  ;;  %v567_v42 = vld [vmem:[#allocation2 + $0xa] sm:$0x3]  ;;  %v643_v47 = vld [vmem:[#allocation2 + $0xc] sm:$0x3] }
 0x107   :  { %v719_v56 = vld [vmem:[#allocation2 + $0xe] sm:$0x3] }
 0x108   :  { %v187_v19 = vld [vmem:[#allocation2] sm:$0x3]  ;;  %v263_v22 = vld [vmem:[#allocation2 + $0x2] sm:$0x3]  ;;  %v339_v27 = vld [vmem:[#allocation2 + $0x4] sm:$0x3] }
 0x109   :  { %v261_v20 = vadd.f32 %v257_v15, %v187_v19  ;;  %v415_v32 = vld [vmem:[#allocation2 + $0x6] sm:$0x3] }
 0x10b   :  { %1097 = vtanh.f32 %v261_v20 }
 0x118   :  { %v1098_v21 = vpop.eup %1097 }
 0x119   :  { %1008 = vmatmul.mubr.msk.f32.vlgmr.msra.gmra.mxu0 %vm98_vm1, %v1098_v21 }
 0x11a   :  { %1022 = vmatpush3.msra.mxu0 %v1326_v5  ;;  %1029 = vmatprep.mubr.msk.f32.mxu0 %vm1250_vm0, %v1249_v0 }
 0x11b   :  { %1023 = vmatprep.subr.mxu0 %v1249_v0 }
 0x11c   :  { %1024 = vmatpush3.msra.mxu0 %v1328_v6 }
 0x11d   :  { %1025 = vmatprep.subr.mxu0 %v1249_v0 }
 0x11e   :  { %1026 = vmatpush3.msra.mxu0 %v1332_v8 }
 0x11f   :  { %1027 = vmatprep.subr.mxu0 %v1249_v0 }
 0x120   :  { %1028 = vmatpush3.msra.mxu0 %v1336_v10 }
 0x121   :  { %1043 = vmatprep.subr.mxu0 %v1249_v0 }
 0x1d9   :  { %v333_v23 = vpop.f32.mrf.mxu0 }
 0x1da   :  { %v337_v24 = vadd.f32 %v333_v23, %v263_v22 }
 0x1db   :  { %v1009_v25 = vpop.f32.mrf.mxu0 }
 0x1dc   :  { %1099 = vtanh.f32 %v337_v24 }
 0x1e9   :  { %v1100_v26 = vpop.eup %1099 }
 0x1ea   :  { %1019 = vmatmul.mubr.msk.f32.vlgmr.msra.gmra.mxu1 %vm98_vm1, %v1100_v26 }
 0x1eb   :  { %1033 = vmatpush3.msra.mxu1 %v1326_v5  ;;  %1040 = vmatprep.mubr.msk.f32.mxu1 %vm1250_vm0, %v1249_v0 }
 0x1ec   :  { %1034 = vmatprep.subr.mxu1 %v1249_v0 }
 0x1ed   :  { %1035 = vmatpush3.msra.mxu1 %v1328_v6 }
 0x1ee   :  { %1036 = vmatprep.subr.mxu1 %v1249_v0 }
 0x1ef   :  { %1037 = vmatpush3.msra.mxu1 %v1332_v8 }
 0x1f0   :  { %1038 = vmatprep.subr.mxu1 %v1249_v0 }
 0x1f1   :  { %1039 = vmatpush3.msra.mxu1 %v1336_v10 }
 0x1f2   :  { %1054 = vmatprep.subr.mxu1 %v1249_v0 }
 0x2aa   :  { %v409_v28 = vpop.f32.mrf.mxu1 }
 0x2ab   :  { %v413_v29 = vadd.f32 %v409_v28, %v339_v27 }
 0x2ac   :  { %v1020_v30 = vpop.f32.mrf.mxu1 }
 0x2ad   :  { %1101 = vtanh.f32 %v413_v29 }
 0x2ba   :  { %v1102_v31 = vpop.eup %1101 }
 0x2bb   :  { %1030 = vmatmul.mubr.msk.f32.vlgmr.msra.gmra.mxu0 %vm98_vm1, %v1102_v31 }
 0x2bc   :  { %1044 = vmatpush3.msra.mxu0 %v1326_v5  ;;  %1051 = vmatprep.mubr.msk.f32.mxu0 %vm1250_vm0, %v1249_v0 }
 0x2bd   :  { %1045 = vmatprep.subr.mxu0 %v1249_v0 }
 0x2be   :  { %1046 = vmatpush3.msra.mxu0 %v1328_v6 }
 0x2bf   :  { %1047 = vmatprep.subr.mxu0 %v1249_v0 }
 0x2c0   :  { %1048 = vmatpush3.msra.mxu0 %v1332_v8 }
 0x2c1   :  { %1049 = vmatprep.subr.mxu0 %v1249_v0 }
 0x2c2   :  { %1050 = vmatpush3.msra.mxu0 %v1336_v10 }
 0x2c3   :  { %1065 = vmatprep.subr.mxu0 %v1249_v0 }
 0x37b   :  { %v485_v33 = vpop.f32.mrf.mxu0 }
 0x37c   :  { %v489_v34 = vadd.f32 %v485_v33, %v415_v32 }
 0x37d   :  { %v1031_v35 = vpop.f32.mrf.mxu0 }
 0x37e   :  { %1103 = vtanh.f32 %v489_v34 }
 0x38b   :  { %v1104_v36 = vpop.eup %1103 }
 0x38c   :  { %1041 = vmatmul.mubr.msk.f32.vlgmr.msra.gmra.mxu1 %vm98_vm1, %v1104_v36 }
 0x38d   :  { %1055 = vmatpush3.msra.mxu1 %v1326_v5  ;;  %1062 = vmatprep.mubr.msk.f32.mxu1 %vm1250_vm0, %v1249_v0 }
 0x38e   :  { %1056 = vmatprep.subr.mxu1 %v1249_v0 }
 0x38f   :  { %1057 = vmatpush3.msra.mxu1 %v1328_v6 }
 0x390   :  { %1058 = vmatprep.subr.mxu1 %v1249_v0 }
 0x391   :  { %1059 = vmatpush3.msra.mxu1 %v1332_v8 }
 0x392   :  { %1060 = vmatprep.subr.mxu1 %v1249_v0 }
 0x393   :  { %1061 = vmatpush3.msra.mxu1 %v1336_v10 }
 0x394   :  { %1076 = vmatprep.subr.mxu1 %v1249_v0 }
 0x44c   :  { %v561_v38 = vpop.f32.mrf.mxu1 }
 0x44d   :  { %v565_v39 = vadd.f32 %v561_v38, %v491_v37 }
 0x44e   :  { %v1042_v40 = vpop.f32.mrf.mxu1 }
 0x44f   :  { %1105 = vtanh.f32 %v565_v39 }
 0x45c   :  { %v1106_v41 = vpop.eup %1105 }
 0x45d   :  { %1052 = vmatmul.mubr.msk.f32.vlgmr.msra.gmra.mxu0 %vm98_vm1, %v1106_v41 }
 0x45e   :  { %1066 = vmatpush3.msra.mxu0 %v1326_v5  ;;  %1073 = vmatprep.mubr.msk.f32.mxu0 %vm1250_vm0, %v1249_v0 }
 0x45f   :  { %1067 = vmatprep.subr.mxu0 %v1249_v0 }
 0x460   :  { %1068 = vmatpush3.msra.mxu0 %v1328_v6 }
 0x461   :  { %1069 = vmatprep.subr.mxu0 %v1249_v0 }
 0x462   :  { %1070 = vmatpush3.msra.mxu0 %v1332_v8 }
 0x463   :  { %1071 = vmatprep.subr.mxu0 %v1249_v0 }
 0x464   :  { %1072 = vmatpush3.msra.mxu0 %v1336_v10 }
 0x51d   :  { %v637_v43 = vpop.f32.mrf.mxu0 }
 0x51e   :  { %v641_v44 = vadd.f32 %v637_v43, %v567_v42 }
 0x51f   :  { %v1053_v45 = vpop.f32.mrf.mxu0 }
 0x520   :  { %1107 = vtanh.f32 %v641_v44 }
 0x52d   :  { %v1108_v46 = vpop.eup %1107 }
 0x52e   :  { %1063 = vmatmul.mubr.msk.f32.vlgmr.msra.gmra.mxu1 %vm98_vm1, %v1108_v46 }
 0x52f   :  { %1084 = vmatprep.mubr.msk.f32.mxu1 %vm1250_vm0, %v1249_v0  ;;  %1077 = vmatpush3.msra.mxu1 %v800_v52 }
 0x530   :  { %1078 = vmatprep.subr.mxu1 %v1249_v0 }
 0x531   :  { %1079 = vmatpush3.msra.mxu1 %v799_v53 }
 0x532   :  { %1080 = vmatprep.subr.mxu1 %v1249_v0 }
 0x533   :  { %1081 = vmatpush3.msra.mxu1 %v798_v54 }
 0x534   :  { %1082 = vmatprep.subr.mxu1 %v1249_v0 }
 0x535   :  { %1083 = vmatpush3.msra.mxu1 %v797_v55 }
 0x5ee   :  { %v713_v48 = vpop.f32.mrf.mxu1 }
 0x5ef   :  { %v717_v49 = vadd.f32 %v713_v48, %v643_v47 }
 0x5f0   :  { %v1064_v50 = vpop.f32.mrf.mxu1 }
 0x5f1   :  { %1109 = vtanh.f32 %v717_v49 }
 0x5fe   :  { %v1110_v51 = vpop.eup %1109 }
 0x5ff   :  { %1074 = vmatmul.mubr.msk.f32.vlgmr.msra.gmra.mxu0 %vm98_vm1, %v1110_v51 }
 0x6bf   :  { %v789_v57 = vpop.f32.mrf.mxu0 }
 0x6c0   :  { %v793_v58 = vadd.f32 %v789_v57, %v719_v56 }
 0x6c1   :  { %v1075_v59 = vpop.f32.mrf.mxu0 }
 0x6c2   :  { %1111 = vtanh.f32 %v793_v58 }
 0x6cf   :  { %v1112_v60 = vpop.eup %1111 }
 0x6d0   :  { %1085 = vmatmul.mubr.msk.f32.vlgmr.msra.gmra.mxu1 %vm98_vm1, %v1112_v60  ;;  %796 = vst.msk [vmem:[#allocation12] sm:$0x3] %vm795_vm2, %v1112_v60 }
 0x6d1   :  { %1204 = shalt.err (!%p1201_p10)
}
 0x6d2   :  { %901 = dma.vmem_to_hbm [thread:$0]  %s899_s26, 32, %s1452_s8, [#allocation13]   ;;  %v924_v61 = vld [vmem:[%s1449_s5] ss:$0 sm:$0xff] }
 0x6d3   :  { %s1252_s10 = smov [#allocation11]  }
 0x6d4   :  { %s888_s11 = sshll.u32 %s1252_s10, 4  ;;  %s889_s11 = int_to_ptr.vmem [resolvable:$true] %s888_s11 }
 0x6d5   :  { %s1213_s12 = scalar_lea.vmem %s889_s11, 32  ;;  %p1218_p12 = scmp.lt.s32.totalorder %s889_s11, %s889_s11 }
 0x6d6   :  { %p1214_p11 = scmp.ne.s32.totalorder %s889_s11, %s1213_s12  ;;  %p1219_p13 = scmp.lt.s32.totalorder %s1213_s12, %s1213_s12 }
 0x6d8   :  { %p1220_p0 = por %p1219_p13, %p1218_p12 }
 0x6da   :  { %p1221_p1 = pnand %p1220_p0, %p1214_p11 }
 0x790   :  { %v877_v62 = vpop.f32.mrf.mxu1 }
 0x791   :  { %v878_v63 = vadd.f32 %v924_v61, %v877_v62 }
 0x792   :  { %v1086_v0 = vpop.f32.mrf.mxu1 }
 0x793   :  { %881 = vst [vmem:[#allocation11] sm:$0x3] %v878_v63 }
 0x794   :  { %1224 = shalt.err (!%p1221_p1)
}
 0x795   :  { %891 = dma.vmem_to_hbm [thread:$0]  %s889_s11, 32, %s1451_s7, [#allocation5]  }
 0x796   :  { %1239 = dma.done.wait [#allocation5], 32  }
 0x797   :  { %1240 = vsyncadd [#allocation5], 4294967264 }
 0x798   :  { %1241 = dma.done.wait [#allocation13], 32  }
 0x799   :  { %1242 = vsyncadd [#allocation13], 4294967264 }
 0x79a   :  { %908 = vsyncpa [#allocation4], 1 }
 0x79b   :  { %909 = vsyncpa [#allocation7], 1 }
 0x79c   :  { %910 = vsyncpa [#allocation10], 1 }
 0x79d   :  { %911 = vsyncpa [#allocation5], 1 }
 0x79e   :  { %912 = vsyncpa [#allocation13], 1 }

</bundles_post_ra>
